<compile_context>
chip_gen: v7x
topology: tpu7x:2x2x1
jax: 0.10.0
libtpu: 0.0.40
codegen_flags: <defaults>
</compile_context>

<pallas_src>
import jax
import jax.numpy as jnp
from jax.experimental import pallas as pl
from jax.experimental.pallas import tpu as pltpu


def _fourier_kernel(a_ref, x_ref, w_ref, s_ref, out_ref):
    # a_ref:   (1, 1)       SMEM scalar
    # x_ref:   (TM, G*d)    VMEM row tile (G logical rows packed per kernel row)
    # w_ref:   (G*d, G*2k)  VMEM, grid-resident packed weight (2*pi folded in)
    # s_ref:   (1, G*2k)    VMEM, grid-resident phase shift (0 -> cos, pi/2 -> sin)
    # out_ref: (TM, G*2k)   VMEM output tile
    a = a_ref[0, 0]
    ang = jax.lax.dot_general(
        x_ref[...], w_ref[...],
        dimension_numbers=(((1,), (0,)), ((), ())),
        preferred_element_type=jnp.float32,
    )
    out_ref[...] = (a * jnp.cos(ang - s_ref[...])).astype(out_ref.dtype)


def _choose_tile_rows(mp, gd, g2k, target=2048, budget_bytes=24 << 20):
    """Pick a row-tile size (multiple of 8) whose double-buffered tiles fit VMEM."""
    tm = min(target, max(8, ((mp + 7) // 8) * 8))
    while tm > 8 and 2 * 4 * tm * (gd + g2k) > budget_bytes:
        tm = max(8, tm // 2)
    return tm


def fourier_embedding(x, B_param, a_param, *, target_tile_rows=2048):
    """x: (B, N, d) f32; B_param: (k, d) f32; a_param: (1, 1) f32 -> (B, N, 2k) f32."""
    Bsz, N, d = x.shape
    k, d2 = B_param.shape
    assert d == d2
    M = Bsz * N
    two_k = 2 * k

    # Row-packing factor: pack G logical rows per kernel row so the store
    # lane width is 128.  Fall back to G=1 when 2k >= 128 or doesn't divide 128.
    if two_k < 128 and 128 % two_k == 0:
        G = 128 // two_k
    else:
        G = 1
    while G > 1 and M % G != 0:
        G //= 2

    Mp = M // G
    gd = G * d
    g2k = G * two_k

    # Packed weight: W = kron(I_G, [2*pi*B^T | 2*pi*B^T])  -> (G*d, G*2k).
    bt = (2.0 * jnp.pi) * B_param.T.astype(jnp.float32)              # (d, k)
    blk = jnp.concatenate([bt, bt], axis=1)                          # (d, 2k)
    W = jnp.kron(jnp.eye(G, dtype=jnp.float32), blk)                 # (G*d, G*2k)

    # Phase shift: sin(t) == cos(t - pi/2); second k of each 2k group is sin.
    shift = jnp.tile(
        jnp.concatenate([jnp.zeros((k,), jnp.float32),
                         jnp.full((k,), jnp.pi / 2, dtype=jnp.float32)]),
        G,
    ).reshape(1, g2k)

    x_packed = x.astype(jnp.float32).reshape(Mp, gd)

    # Tile rows; pad the row count to a multiple of the tile.
    tm = _choose_tile_rows(Mp, gd, g2k, target=target_tile_rows)
    Mp_pad = ((Mp + tm - 1) // tm) * tm
    if Mp_pad != Mp:
        x_packed = jnp.pad(x_packed, ((0, Mp_pad - Mp), (0, 0)))

    grid = (Mp_pad // tm,)

    # 2 buffers x (x tile + out tile) + resident W/shift + headroom, clamped.
    vmem_bytes = 2 * 4 * tm * (gd + g2k) + 4 * (gd * g2k + g2k) + (4 << 20)
    vmem_bytes = int(min(max(vmem_bytes, 8 << 20), 32 << 20))

    a_smem = jnp.asarray(a_param, dtype=jnp.float32).reshape(1, 1)

    out_packed = pl.pallas_call(
        _fourier_kernel,
        out_shape=jax.ShapeDtypeStruct((Mp_pad, g2k), jnp.float32),
        grid_spec=pltpu.PrefetchScalarGridSpec(
            num_scalar_prefetch=0,
            grid=grid,
            in_specs=[
                pl.BlockSpec(memory_space=pltpu.SMEM),            # a (1,1) scalar
                pl.BlockSpec((tm, gd), lambda i: (i, 0)),         # x row tiles
                pl.BlockSpec((gd, g2k), lambda i: (0, 0)),        # W (resident)
                pl.BlockSpec((1, g2k), lambda i: (0, 0)),         # shift (resident)
            ],
            out_specs=pl.BlockSpec((tm, g2k), lambda i: (i, 0)),
        ),
        compiler_params=pltpu.CompilerParams(
            dimension_semantics=("parallel",),
            vmem_limit_bytes=vmem_bytes,
        ),
    )(a_smem, x_packed, W, shift)

    # Undo padding and packing: (Mp, G*2k) row-major == (M, 2k) row-major.
    out = out_packed[:Mp].reshape(Bsz, N, two_k)
    return out


if __name__ == "__main__":
    key = jax.random.PRNGKey(0)
    kx, kb = jax.random.split(key)

    # Small shapes consistent with the module's forward: x is (B, N, input_dim).
    batch, seq, input_dim, output_dim = 2, 8, 4, 32
    sigma = 1.0

    x = jax.random.normal(kx, (batch, seq, input_dim), dtype=jnp.float32)
    # Deterministic parameter init (mirrors sigma * randn(output_dim, input_dim)).
    B_param = sigma * jax.random.normal(kb, (output_dim, input_dim), dtype=jnp.float32)
    a_param = jnp.ones((1, 1), dtype=jnp.float32)

    out = fourier_embedding(x, B_param, a_param)
    out = jax.block_until_ready(out)

    # Reference (pure JAX) check of forward semantics.
    bx_ref = jnp.einsum("bnd,kd->bnk", x, B_param)
    ref = jnp.concatenate(
        [a_param[0, 0] * jnp.cos(2 * jnp.pi * bx_ref),
         a_param[0, 0] * jnp.sin(2 * jnp.pi * bx_ref)],
        axis=2,
    )
    assert out.shape == (batch, seq, 2 * output_dim)
    assert jnp.allclose(out, ref, atol=3e-5, rtol=1e-5)

    print("KERNEL_OK")
</pallas_src>

<mosaic_0001>
module attributes {stable_mosaic.version = 11 : i64} {
  func.func @_fourier_kernel(%arg0: i32, %arg1: memref<1x1xf32, #tpu.memory_space<smem>>, %arg2: memref<8x8xf32, #tpu.memory_space<vmem>>, %arg3: memref<8x128xf32, #tpu.memory_space<vmem>>, %arg4: memref<1x128xf32, #tpu.memory_space<vmem>>, %arg5: memref<8x128xf32, #tpu.memory_space<vmem>>) attributes {dimension_semantics = [#tpu.dimension_semantics<parallel>], iteration_bounds = array<i64: 1>, scalar_prefetch = 0 : i64, scratch_operands = 0 : i64, tpu.core_type = #tpu.core_type<tc>, window_params = [{transform_indices = @transform_0, window_bounds = array<i64: 1, 1>}, {transform_indices = @transform_1, window_bounds = array<i64: 8, 8>}, {pipeline_mode = #tpu.pipeline_mode<synchronous>, transform_indices = @transform_2, window_bounds = array<i64: 8, 128>}, {pipeline_mode = #tpu.pipeline_mode<synchronous>, transform_indices = @transform_3, window_bounds = array<i64: 1, 128>}, {transform_indices = @transform_4, window_bounds = array<i64: 8, 128>}]} {
    %c0 = arith.constant 0 : index
    %c0_0 = arith.constant 0 : index
    %0 = memref.load %arg1[%c0, %c0_0] : memref<1x1xf32, #tpu.memory_space<smem>>
    %c0_1 = arith.constant 0 : index
    %c0_2 = arith.constant 0 : index
    %1 = vector.load %arg2[%c0_1, %c0_2] : memref<8x8xf32, #tpu.memory_space<vmem>>, vector<8x8xf32>
    %c0_3 = arith.constant 0 : index
    %c0_4 = arith.constant 0 : index
    %2 = vector.load %arg3[%c0_3, %c0_4] : memref<8x128xf32, #tpu.memory_space<vmem>>, vector<8x128xf32>
    %cst = arith.constant dense<0.000000e+00> : vector<8x128xf32>
    %3 = tpu.matmul %1, %2, %cst {dimension_numbers = #tpu.dot_dimension_numbers<[1], [0], [0], [1], [0, 0, 1, 1], [], []>} : vector<8x8xf32>, vector<8x128xf32>, vector<8x128xf32> -> vector<8x128xf32>
    %c0_5 = arith.constant 0 : index
    %c0_6 = arith.constant 0 : index
    %4 = vector.load %arg4[%c0_5, %c0_6] : memref<1x128xf32, #tpu.memory_space<vmem>>, vector<1x128xf32>
    %5 = vector.broadcast %4 : vector<1x128xf32> to vector<8x128xf32>
    %6 = arith.subf %3, %5 : vector<8x128xf32>
    %7 = math.cos %6 : vector<8x128xf32>
    %8 = vector.broadcast %0 : f32 to vector<8x128xf32>
    %9 = arith.mulf %8, %7 : vector<8x128xf32>
    %c0_7 = arith.constant 0 : index
    %c0_8 = arith.constant 0 : index
    %10 = vector.load %arg5[%c0_7, %c0_8] : memref<8x128xf32, #tpu.memory_space<vmem>>, vector<8x128xf32>
    tpu.vector_store %arg5[%c0_7, %c0_8], %9 {strides = array<i32>} : memref<8x128xf32, #tpu.memory_space<vmem>>, vector<8x128xf32>,
    return
  }
  func.func @transform_0(%arg0: i32) -> (i32, i32) {
    %c0_i32 = arith.constant 0 : i32
    %c0_i32_0 = arith.constant 0 : i32
    %c0_i32_1 = arith.constant 0 : i32
    return %c0_i32, %c0_i32_0 : i32, i32
  }
  func.func @transform_1(%arg0: i32) -> (i32, i32) {
    %c0_i32 = arith.constant 0 : i32
    %c0_i32_0 = arith.constant 0 : i32
    return %arg0, %c0_i32 : i32, i32
  }
  func.func @transform_2(%arg0: i32) -> (i32, i32) {
    %c0_i32 = arith.constant 0 : i32
    %c0_i32_0 = arith.constant 0 : i32
    %c0_i32_1 = arith.constant 0 : i32
    return %c0_i32, %c0_i32_0 : i32, i32
  }
  func.func @transform_3(%arg0: i32) -> (i32, i32) {
    %c0_i32 = arith.constant 0 : i32
    %c0_i32_0 = arith.constant 0 : i32
    %c0_i32_1 = arith.constant 0 : i32
    return %c0_i32, %c0_i32_0 : i32, i32
  }
  func.func @transform_4(%arg0: i32) -> (i32, i32) {
    %c0_i32 = arith.constant 0 : i32
    %c0_i32_0 = arith.constant 0 : i32
    return %arg0, %c0_i32 : i32, i32
  }
}

</mosaic_0001>

<bundles_post_ra>
// kernel: tpu_custom_call.1
= control target key start
LH: loop header
LB: loop body
LE: loop exit
PB: predicated region body
PF: predicated region fallthrough
CT: control target
= control target key end

     0   :  { %10 = vsyncpa [#allocation4], 0  ;;  %s453_s0 = inlined_call_operand.<no memory space> [shape: f32[1,1], index: 0, kind: input, shape index: {}]   ;;  %s454_s1 = inlined_call_operand.hbm [shape: f32[8,8], index: 1, kind: input, shape index: {}]   ;;  %s455_s2 = inlined_call_operand.hbm [shape: f32[8,128], index: 2, kind: input, shape index: {}]   ;;  %s456_s3 = inlined_call_operand.vmem [shape: f32[1,128], index: 3, kind: input, shape index: {}]   ;;  %s457_s4 = inlined_call_operand.hbm [shape: f32[8,128], index: 4, kind: output, shape index: {}]  }
   0x1   :  { %11 = vsyncpa [#allocation7], 0 }
   0x2   :  { %12 = vsyncpa [#allocation5], 0  ;;  %s354_s15 = smov [#allocation3]   ;;  %s355_s17 = smov [#allocation6]  }
   0x3   :  { %s21_s16 = sshll.u32 %s354_s15, 4  ;;  %s31_s18 = sshll.u32 %s355_s17, 4  ;;  %s22_s16 = int_to_ptr.vmem [resolvable:$true] %s21_s16  ;;  %s32_s18 = int_to_ptr.vmem [resolvable:$true] %s31_s18 }
   0x4   :  { %s282_s21 = scalar_lea.hbm %s454_s1, 128 }
   0x5   :  { %p283_p0 = scmp.ne.s32.totalorder %s454_s1, %s282_s21  ;;  %p286_p1 = scmp.lt.u32.totalorder %s282_s21, %s454_s1 }
   0x7   :  { %p288_p2 = pnand %p286_p1, %p283_p0 }
   0x9   :  { %291 = shalt.err (!%p288_p2)
}
   0xa   :  { %s292_s26 = scalar_lea.vmem %s22_s16, 128  ;;  %p297_p4 = scmp.lt.s32.totalorder %s22_s16, %s22_s16 }
   0xb   :  { %p293_p3 = scmp.ne.s32.totalorder %s22_s16, %s292_s26  ;;  %p298_p5 = scmp.lt.s32.totalorder %s292_s26, %s292_s26 }
   0xd   :  { %p299_p6 = por %p298_p5, %p297_p4 }
   0xf   :  { %p300_p7 = pnand %p299_p6, %p293_p3 }
  0x11   :  { %303 = shalt.err (!%p300_p7)
}
  0x12   :  { %24 = dma.hbm_to_vmem [thread:$0]  %s454_s1, 128, %s22_s16, [#allocation4]  }
  0x13   :  { %s304_s5 = scalar_lea.hbm %s455_s2, 128 }
  0x14   :  { %p305_p8 = scmp.ne.s32.totalorder %s455_s2, %s304_s5  ;;  %p308_p9 = scmp.lt.u32.totalorder %s304_s5, %s455_s2 }
  0x16   :  { %p310_p10 = pnand %p308_p9, %p305_p8 }
  0x18   :  { %313 = shalt.err (!%p310_p10)
}
  0x19   :  { %s314_s10 = scalar_lea.vmem %s32_s18, 128  ;;  %p319_p12 = scmp.lt.s32.totalorder %s32_s18, %s32_s18 }
  0x1a   :  { %p315_p11 = scmp.ne.s32.totalorder %s32_s18, %s314_s10  ;;  %p320_p13 = scmp.lt.s32.totalorder %s314_s10, %s314_s10 }
  0x1c   :  { %p321_p0 = por %p320_p13, %p319_p12 }
  0x1e   :  { %p322_p1 = pnand %p321_p0, %p315_p11 }
  0x20   :  { %325 = shalt.err (!%p322_p1)
}
  0x21   :  { %34 = dma.hbm_to_vmem [thread:$0]  %s455_s2, 128, %s32_s18, [#allocation7]  }
  0x22   :  { %348 = dma.done.wait [#allocation4], 128  }
  0x23   :  { %349 = vsyncadd [#allocation4], 4294967168 }
  0x24   :  { %350 = dma.done.wait [#allocation7], 128  }
  0x25   :  { %351 = vsyncadd [#allocation7], 4294967168  ;;  %v356_v0 = vmov 0.0   ;;  %vm357_vm0 = vmmov 0   ;;  %vm46_vm1 = vcmask 64512   ;;  %v45_v1 = vld [vmem:[#allocation6] sm:$0xff] }
  0x26   :  { %258 = vmatprep.subr.mxu0 %v356_v0  ;;  %260 = vmatprep.mubr.msk.f32.mxu0 %vm357_vm0, %v356_v0  ;;  %v44_v2 = vld [vmem:[#allocation3] sm:$0xff]  ;;  %v358_v17 = vmov 683565275   ;;  %v359_v19 = vmov 2475754826   ;;  %s364_s14 = smov [#allocation8]  }
  0x27   :  { %259 = vmatpush3.msra.mxu0 %v45_v1  ;;  %v251_v3 = vld [vmem:[%s456_s3] ss:$0 sm:$0xff]  ;;  %v360_v22 = vmov 2131351028   ;;  %v361_v25 = vmov 2102212464  }
  0x28   :  { %261 = vmatmul.mubr.msk.f32.vlgmr.msra.gmra.mrb[0].mxu0 %vm46_vm1, %v44_v2  ;;  %v362_v28 = vmov 920167782   ;;  %v363_v31 = vmov 1326507024   ;;  %s240_s15 = sshll.u32 %s364_s14, 4  ;;  %s241_s15 = int_to_ptr.vmem [resolvable:$true] %s240_s15 }
  0x29   :  { %s326_s16 = scalar_lea.vmem %s241_s15, 128  ;;  %p331_p3 = scmp.lt.s32.totalorder %s241_s15, %s241_s15 }
  0x2a   :  { %p327_p2 = scmp.ne.s32.totalorder %s241_s15, %s326_s16  ;;  %p332_p4 = scmp.lt.s32.totalorder %s326_s16, %s326_s16 }
  0x2c   :  { %p333_p5 = por %p332_p4, %p331_p3 }
  0x2e   :  { %p334_p6 = pnand %p333_p5, %p327_p2 }
  0xfb   :  { %v116_v4 = vpop.f32.mrb[0].mxu0 }
  0xfc   :  { %v417_v5 = vsub.f32 %v116_v4, %v251_v3  ;;  %v262_v6 = vpop.f32.mrb[1].mxu0 }
  0xfe   :  { %v131_v7 = vand.u32 2139095040, %v417_v5  ;;  %v128_v11 = vand.u32 2147483647, %v417_v5  ;;  %vm130_vm9 = vcmp.lt.s32.totalorder %v417_v5, 0  ;;  %vm220_vm14 = vweird.f32 %v417_v5 }
 0x100   :  { %v132_v8 = vshrl.u32 %v131_v7, 23  ;;  %v135_v14 = vand.u32 8388607, %v128_v11  ;;  %vm129_vm10 = vcmp.le.f32.partialorder %v128_v11, 0.7853982  ;;  %v231_v11 = vstv %s453_s0 }
 0x102   :  { %v252_v9 = vadd.s32 4294967169, %v132_v8  ;;  %v136_v33 = vor.u32 8388608, %v135_v14 }
 0x104   :  { %v138_v10 = vadd.s32 1, %v252_v9  ;;  %v176_v47 = vshll.u32 %v136_v33, 8 }
 0x106   :  { %vm139_vm2 = vcmp.gt.s32.totalorder %v138_v10, 0 }
 0x107   :  { %v140_v12 = vsel %vm139_vm2, %v138_v10, 0 }
 0x108   :  { %v142_v13 = vand.u32 31, %v140_v12  ;;  %v141_v16 = vshrl.u32 %v140_v12, 5 }
 0x10a   :  { %v143_v15 = vsub.s32 32, %v142_v13  ;;  %v145_v18 = vshll.u32 %v358_v17, %v142_v13  ;;  %v148_v20 = vshll.u32 %v359_v19, %v142_v13  ;;  %v151_v24 = vshll.u32 %v360_v22, %v142_v13 }
 0x10b   :  { %v154_v27 = vshll.u32 %v361_v25, %v142_v13  ;;  %v157_v30 = vshll.u32 %v362_v28, %v142_v13  ;;  %vm160_vm3 = vcmp.lt.s32.totalorder %v141_v16, 1  ;;  %vm163_vm4 = vcmp.lt.s32.totalorder %v141_v16, 4 }
 0x10c   :  { %v146_v21 = vshrl.u32 %v359_v19, %v143_v15  ;;  %v149_v23 = vshrl.u32 %v360_v22, %v143_v15  ;;  %v152_v26 = vshrl.u32 %v361_v25, %v143_v15  ;;  %v155_v29 = vshrl.u32 %v362_v28, %v143_v15 }
 0x10d   :  { %v158_v32 = vshrl.u32 %v363_v31, %v143_v15  ;;  %v144_v42 = vshrl.u32 %v358_v17, %v143_v15  ;;  %vm162_vm5 = vcmp.lt.s32.totalorder %v141_v16, 3  ;;  %vm161_vm6 = vcmp.lt.s32.totalorder %v141_v16, 2 }
 0x10e   :  { %v147_v34 = vor.u32 %v146_v21, %v145_v18  ;;  %v150_v35 = vor.u32 %v149_v23, %v148_v20  ;;  %v153_v36 = vor.u32 %v152_v26, %v151_v24  ;;  %v156_v37 = vor.u32 %v155_v29, %v154_v27 }
 0x10f   :  { %v159_v38 = vor.u32 %v158_v32, %v157_v30 }
 0x110   :  { %v165_v39 = vsel %vm163_vm4, %v153_v36, 2102212464  ;;  %v168_v40 = vsel %vm160_vm3, %v147_v34, %v150_v35  ;;  %v172_v41 = vsel %vm160_vm3, %v150_v35, %v153_v36  ;;  %v169_v43 = vsel %vm163_vm4, %v156_v37, 920167782 }
 0x111   :  { %v173_v44 = vsel %vm163_vm4, %v159_v38, 1326507024  ;;  %v170_v45 = vsel %vm162_vm5, %v153_v36, %v169_v43  ;;  %v164_v48 = vsel %vm160_vm3, %v144_v42, %v147_v34  ;;  %v166_v49 = vsel %vm162_vm5, %v150_v35, %v165_v39 }
 0x112   :  { %v174_v46 = vsel %vm162_vm5, %v156_v37, %v173_v44  ;;  %v171_v50 = vsel %vm161_vm6, %v168_v40, %v170_v45  ;;  %v167_v56 = vsel %vm161_vm6, %v164_v48, %v166_v49 }
 0x113   :  { %v175_v51 = vsel %vm161_vm6, %v172_v41, %v174_v46  ;;  %v426_v54 = vmul.u32.u64.low %v176_v47, %v171_v50  ;;  %v427_v55 = vmul.u32.u64.high %v176_v47, %v171_v50, %v426_v54  ;;  %v183_v58 = vmul.u32 %v176_v47, %v167_v56 }
 0x114   :  { %v423_v52 = vmul.u32.u64.low %v176_v47, %v175_v51  ;;  %v424_v53 = vmul.u32.u64.high %v176_v47, %v175_v51, %v423_v52 }
 0x115   :  { %v186_v57 = vadd.s32 1, %v427_v55 }
 0x116   :  { %vm185_vm7 = vc.u32 %v424_v53, %v426_v54  ;;  %v184_v7 = vadd.s32 %v426_v54, %v424_v53 }
 0x117   :  { %v187_v59 = vsel %vm185_vm7, %v186_v57, %v427_v55 }
 0x118   :  { %v188_v60 = vadd.s32 %v187_v59, %v183_v58 }
 0x11a   :  { %v189_v61 = vadd.s32 536870912, %v188_v60 }
 0x11c   :  { %v190_v62 = vshrl.u32 %v189_v61, 30 }
 0x11e   :  { %v191_v63 = vshll.u32 %v190_v62, 30  ;;  %v214_v22 = vsub.s32 4, %v190_v62 }
 0x120   :  { %v192_v0 = vsub.s32 %v188_v60, %v191_v63  ;;  %v215_v24 = vsel %vm130_vm9, %v214_v22, %v190_v62 }
 0x121   :  { %v217_v25 = vsel %vm129_vm10, 0, %v215_v24 }
 0x122   :  { %v194_v1 = vsub.s32 0, %v192_v0  ;;  %v221_v26 = vand.u32 3, %v217_v25 }
 0x124   :  { %v253_v2 = vmin.u32 %v194_v1, %v192_v0  ;;  %vm226_vm11 = vcmp.eq.s32.totalorder %v221_v26, 2  ;;  %vm223_vm12 = vcmp.eq.s32.totalorder %v221_v26, 0  ;;  %vm222_vm13 = vcmp.lt.s32.totalorder %v221_v26, 2 }
 0x126   :  { %v196_v3 = vclz %v253_v2 }
 0x128   :  { %v254_v4 = vadd.s32 4294967294, %v196_v3 }
 0x12a   :  { %vm255_vm8 = vcmp.lt.s32.totalorder %v254_v4, 0 }
 0x12b   :  { %v199_v6 = vsel %vm255_vm8, 0, %v254_v4 }
 0x12c   :  { %v200_v8 = vsub.s32 32, %v199_v6  ;;  %v204_v9 = vsub.s32 4294967266, %v199_v6  ;;  %v201_v10 = vshll.u32 %v192_v0, %v199_v6 }
 0x12e   :  { %v202_v12 = vshrl.u32 %v184_v7, %v200_v8  ;;  %v205_v13 = vadd.s32 127, %v204_v9 }
 0x130   :  { %v203_v14 = vor.u32 %v202_v12, %v201_v10  ;;  %v206_v15 = vshll.u32 %v205_v13, 23 }
 0x132   :  { %v207_v16 = vor.u32 4788187, %v206_v15  ;;  %v210_v18 = vcvt.s32.f32 %v203_v14 }
 0x134   :  { %v208_v17 = vand.u32 2147483647, %v207_v16 }
 0x136   :  { %v211_v19 = vmul.f32 %v210_v18, %v208_v17 }
 0x138   :  { %v212_v20 = vxor.u32 2147483648, %v211_v19 }
 0x13a   :  { %v213_v21 = vsel %vm130_vm9, %v212_v20, %v211_v19 }
 0x13b   :  { %v216_v23 = vsel %vm129_vm10, %v417_v5, %v213_v21 }
 0x13c   :  { %278 = vcosq.f32 %v216_v23 }
 0x13d   :  { %280 = vsinq.f32 %v216_v23 }
 0x146   :  { %v279_v27 = vpop.eup %278 }
 0x147   :  { %v281_v28 = vpop.eup %280  ;;  %v227_v29 = vxor.u32 2147483648, %v279_v27 }
 0x148   :  { %v224_v30 = vxor.u32 2147483648, %v281_v28 }
 0x149   :  { %v228_v31 = vsel %vm226_vm11, %v227_v29, %v281_v28 }
 0x14a   :  { %v225_v32 = vsel %vm223_vm12, %v279_v27, %v224_v30 }
 0x14b   :  { %v229_v33 = vsel %vm222_vm13, %v225_v32, %v228_v31 }
 0x14c   :  { %v230_v34 = vsel %vm220_vm14, nan, %v229_v33 }
 0x14d   :  { %v232_v35 = vmul.f32 %v231_v11, %v230_v34 }
 0x14f   :  { %233 = vst [vmem:[#allocation8] sm:$0xff] %v232_v35 }
 0x150   :  { %337 = shalt.err (!%p334_p6)
}
 0x151   :  { %s338_s0 = scalar_lea.hbm %s457_s4, 128 }
 0x152   :  { %p339_p7 = scmp.ne.s32.totalorder %s457_s4, %s338_s0  ;;  %p342_p8 = scmp.lt.u32.totalorder %s338_s0, %s457_s4 }
 0x154   :  { %p344_p9 = pnand %p342_p8, %p339_p7 }
 0x156   :  { %347 = shalt.err (!%p344_p9)
}
 0x157   :  { %243 = dma.vmem_to_hbm [thread:$0]  %s241_s15, 128, %s457_s4, [#allocation5]  }
 0x158   :  { %352 = dma.done.wait [#allocation5], 128  }
 0x159   :  { %353 = vsyncadd [#allocation5], 4294967168 }
 0x15a   :  { %247 = vsyncpa [#allocation4], 1 }
 0x15b   :  { %248 = vsyncpa [#allocation7], 1 }
 0x15c   :  { %249 = vsyncpa [#allocation5], 1 }

</bundles_post_ra>
